<compile_context>
chip_gen: v6e
topology: v6e:2x2x1
jax: 0.10.0
libtpu: 0.0.40
codegen_flags: <defaults>
</compile_context>

<pallas_src>
import jax
import jax.numpy as jnp
from jax.experimental import pallas as pl
from jax.experimental.pallas import tpu as pltpu

_HP = jax.lax.Precision.HIGHEST


def mlp_kernel(xt_ref, w1t_ref, b1_ref, w2t_ref, b2_ref, w3_ref, b3_ref, o_ref):
    xt = xt_ref[...]                                            # (21, TB) f32

    # layer_1: (32,21) @ (21,TB) -> (32,TB); bias broadcast over lanes; tanh on EUP
    h1 = jnp.dot(w1t_ref[...], xt,
                 preferred_element_type=jnp.float32, precision=_HP)
    h1 = jnp.tanh(h1 + b1_ref[...])                             # (32, TB)

    # layer_2: (32,32) @ (32,TB) -> (32,TB); relu on VPU
    h2 = jnp.dot(w2t_ref[...], h1,
                 preferred_element_type=jnp.float32, precision=_HP)
    h2 = jnp.maximum(h2 + b2_ref[...], 0.0)                     # (32, TB)

    # layer_3: 32 -> 1 as VPU multiply + sublane (axis-0) reduce on the XLU;
    # result is already in lane-dense (1, TB) layout.  b3 is a scalar in SMEM.
    out = jnp.sum(h2 * w3_ref[...], axis=0, keepdims=True) + b3_ref[0]
    o_ref[...] = out.astype(o_ref.dtype)                        # (1, TB)


def _round_up(n, m):
    return ((n + m - 1) // m) * m


def linear_model_forward(x, params, *, tile_b=8192):
    """x: (B, 21) float32. params: dict of weights/biases. Returns (B, 1) f32."""
    # Feature-major weight prep (one-time, outside the kernel).
    w1t = params["w1"].T                                  # (32, 21)
    b1c = params["b1"].reshape(-1, 1)                     # (32, 1)
    w2t = params["w2"].T                                  # (32, 32)
    b2c = params["b2"].reshape(-1, 1)                     # (32, 1)
    w3c = params["w3"].reshape(-1, 1)                     # (32, 1)
    b3 = params["b3"].reshape(1).astype(jnp.float32)      # (1,) scalar -> SMEM

    B, f_in = x.shape
    h1_dim = w1t.shape[0]
    h2_dim = w2t.shape[0]

    # Tile selection: TB is a lane multiple (128); default 8192 (multiple of
    # 2048) to amortize per-step overhead; shrink so n_tiles >= 2 when the
    # batch allows it (v7x megacore).
    tile_b = _round_up(max(tile_b, 2048), 2048)
    B_128 = _round_up(B, 128)
    half = _round_up(max((B_128 + 1) // 2, 128), 128)
    TB = min(tile_b, half)
    B_pad = _round_up(B_128, TB)
    n_tiles = B_pad // TB

    if B_pad != B:
        x = jnp.pad(x, ((0, B_pad - B), (0, 0)))
    x_t = x.T                                             # (21, B_pad), cheap XLA transpose

    param_bytes = 4 * (w1t.size + b1c.size + w2t.size + b2c.size + w3c.size + 1)
    cost = pl.CostEstimate(
        flops=int(B_pad * (2 * f_in * h1_dim + 2 * h1_dim * h2_dim + 2 * h2_dim)),
        transcendentals=int(B_pad * h1_dim),
        bytes_accessed=int(4 * B_pad * f_in + 4 * B_pad + param_bytes),
    )

    out_lanes = pl.pallas_call(
        mlp_kernel,
        out_shape=jax.ShapeDtypeStruct((1, B_pad), jnp.float32),
        grid=(n_tiles,),
        in_specs=[
            pl.BlockSpec((f_in, TB), lambda i: (0, i)),          # x^T: batch in lanes
            pl.BlockSpec(w1t.shape, lambda i: (0, 0)),           # weights resident
            pl.BlockSpec(b1c.shape, lambda i: (0, 0)),
            pl.BlockSpec(w2t.shape, lambda i: (0, 0)),
            pl.BlockSpec(b2c.shape, lambda i: (0, 0)),
            pl.BlockSpec(w3c.shape, lambda i: (0, 0)),
            pl.BlockSpec(memory_space=pltpu.MemorySpace.SMEM),   # b3 scalar
        ],
        out_specs=pl.BlockSpec((1, TB), lambda i: (0, i)),       # lane-dense output slab
        compiler_params=pltpu.CompilerParams(
            dimension_semantics=("parallel",),                   # megacore on v7x
        ),
        cost_estimate=cost,
    )(x_t, w1t, b1c, w2t, b2c, w3c, b3)

    # (1, B_pad) -> (B, 1), dropping padded columns.
    return out_lanes.reshape(B_pad, 1)[:B]


def init_params(key):
    """Deterministic init mimicking torch.nn.Linear (U[-1/sqrt(fan_in), +...])."""
    ks = jax.random.split(key, 6)

    def linear(kw, kb, fan_in, fan_out):
        bound = 1.0 / jnp.sqrt(fan_in)
        w = jax.random.uniform(kw, (fan_in, fan_out), jnp.float32, -bound, bound)
        b = jax.random.uniform(kb, (1, fan_out), jnp.float32, -bound, bound)
        return w, b

    w1, b1 = linear(ks[0], ks[1], 21, 32)
    w2, b2 = linear(ks[2], ks[3], 32, 32)
    w3, b3 = linear(ks[4], ks[5], 32, 1)
    return {"w1": w1, "b1": b1, "w2": w2, "b2": b2, "w3": w3, "b3": b3}


def reference_forward(x, p):
    h1 = jnp.tanh(jnp.dot(x, p["w1"], precision=_HP) + p["b1"])
    h2 = jax.nn.relu(jnp.dot(h1, p["w2"], precision=_HP) + p["b2"])
    return jnp.dot(h2, p["w3"], precision=_HP) + p["b3"]


if __name__ == "__main__":
    key = jax.random.PRNGKey(0)
    k_x, k_p = jax.random.split(key)

    batch, n_features = 8, 21
    x = jax.random.normal(k_x, (batch, n_features), jnp.float32)
    params = init_params(k_p)

    out = jax.block_until_ready(linear_model_forward(x, params))
    ref = reference_forward(x, params)

    assert out.shape == (batch, 1)
    assert jnp.allclose(out, ref, atol=1e-5, rtol=1e-5), "mismatch vs reference"

    print("KERNEL_OK")
</pallas_src>

<mosaic_0001>
module attributes {stable_mosaic.version = 11 : i64} {
  func.func @mlp_kernel(%arg0: i32, %arg1: memref<21x128xf32, #tpu.memory_space<vmem>>, %arg2: memref<32x21xf32, #tpu.memory_space<vmem>>, %arg3: memref<32x1xf32, #tpu.memory_space<vmem>>, %arg4: memref<32x32xf32, #tpu.memory_space<vmem>>, %arg5: memref<32x1xf32, #tpu.memory_space<vmem>>, %arg6: memref<32x1xf32, #tpu.memory_space<vmem>>, %arg7: memref<1xf32, #tpu.memory_space<smem>>, %arg8: memref<1x128xf32, #tpu.memory_space<vmem>>) attributes {dimension_semantics = [#tpu.dimension_semantics<parallel>], iteration_bounds = array<i64: 1>, scalar_prefetch = 0 : i64, scratch_operands = 0 : i64, tpu.core_type = #tpu.core_type<tc>, window_params = [{transform_indices = @transform_0, window_bounds = array<i64: 21, 128>}, {pipeline_mode = #tpu.pipeline_mode<synchronous>, transform_indices = @transform_1, window_bounds = array<i64: 32, 21>}, {pipeline_mode = #tpu.pipeline_mode<synchronous>, transform_indices = @transform_2, window_bounds = array<i64: 32, 1>}, {pipeline_mode = #tpu.pipeline_mode<synchronous>, transform_indices = @transform_3, window_bounds = array<i64: 32, 32>}, {pipeline_mode = #tpu.pipeline_mode<synchronous>, transform_indices = @transform_4, window_bounds = array<i64: 32, 1>}, {pipeline_mode = #tpu.pipeline_mode<synchronous>, transform_indices = @transform_5, window_bounds = array<i64: 32, 1>}, {transform_indices = @transform_6, window_bounds = array<i64: 1>}, {transform_indices = @transform_7, window_bounds = array<i64: 1, 128>}]} {
    %c0 = arith.constant 0 : index
    %c0_0 = arith.constant 0 : index
    %0 = vector.load %arg1[%c0, %c0_0] : memref<21x128xf32, #tpu.memory_space<vmem>>, vector<21x128xf32>
    %c0_1 = arith.constant 0 : index
    %c0_2 = arith.constant 0 : index
    %1 = vector.load %arg2[%c0_1, %c0_2] : memref<32x21xf32, #tpu.memory_space<vmem>>, vector<32x21xf32>
    %cst = arith.constant dense<0.000000e+00> : vector<32x128xf32>
    %2 = tpu.matmul %1, %0, %cst {dimension_numbers = #tpu.dot_dimension_numbers<[1], [0], [0], [1], [0, 0, 1, 1], [], []>, precision = #tpu.contract_precision<fp32>} : vector<32x21xf32>, vector<21x128xf32>, vector<32x128xf32> -> vector<32x128xf32>
    %c0_3 = arith.constant 0 : index
    %c0_4 = arith.constant 0 : index
    %3 = vector.load %arg3[%c0_3, %c0_4] : memref<32x1xf32, #tpu.memory_space<vmem>>, vector<32x1xf32>
    %4 = vector.broadcast %3 : vector<32x1xf32> to vector<32x128xf32>
    %5 = arith.addf %2, %4 : vector<32x128xf32>
    %6 = math.tanh %5 : vector<32x128xf32>
    %c0_5 = arith.constant 0 : index
    %c0_6 = arith.constant 0 : index
    %7 = vector.load %arg4[%c0_5, %c0_6] : memref<32x32xf32, #tpu.memory_space<vmem>>, vector<32x32xf32>
    %cst_7 = arith.constant dense<0.000000e+00> : vector<32x128xf32>
    %8 = tpu.matmul %7, %6, %cst_7 {dimension_numbers = #tpu.dot_dimension_numbers<[1], [0], [0], [1], [0, 0, 1, 1], [], []>, precision = #tpu.contract_precision<fp32>} : vector<32x32xf32>, vector<32x128xf32>, vector<32x128xf32> -> vector<32x128xf32>
    %c0_8 = arith.constant 0 : index
    %c0_9 = arith.constant 0 : index
    %9 = vector.load %arg5[%c0_8, %c0_9] : memref<32x1xf32, #tpu.memory_space<vmem>>, vector<32x1xf32>
    %10 = vector.broadcast %9 : vector<32x1xf32> to vector<32x128xf32>
    %11 = arith.addf %8, %10 : vector<32x128xf32>
    %cst_10 = arith.constant 0.000000e+00 : f32
    %12 = vector.broadcast %cst_10 : f32 to vector<32x128xf32>
    %13 = arith.maximumf %11, %12 : vector<32x128xf32>
    %c0_11 = arith.constant 0 : index
    %c0_12 = arith.constant 0 : index
    %14 = vector.load %arg6[%c0_11, %c0_12] : memref<32x1xf32, #tpu.memory_space<vmem>>, vector<32x1xf32>
    %15 = vector.broadcast %14 : vector<32x1xf32> to vector<32x128xf32>
    %16 = arith.mulf %13, %15 : vector<32x128xf32>
    %cst_13 = arith.constant dense<0.000000e+00> : vector<128xf32>
    %17 = vector.multi_reduction <add>, %16, %cst_13 [0] : vector<32x128xf32> to vector<128xf32>
    %18 = vector.shape_cast %17 : vector<128xf32> to vector<1x128xf32>
    %c0_14 = arith.constant 0 : index
    %19 = memref.load %arg7[%c0_14] : memref<1xf32, #tpu.memory_space<smem>>
    %20 = vector.broadcast %19 : f32 to vector<1x128xf32>
    %21 = arith.addf %18, %20 : vector<1x128xf32>
    %c0_15 = arith.constant 0 : index
    %c0_16 = arith.constant 0 : index
    %22 = vector.load %arg8[%c0_15, %c0_16] : memref<1x128xf32, #tpu.memory_space<vmem>>, vector<1x128xf32>
    tpu.vector_store %arg8[%c0_15, %c0_16], %21 {strides = array<i32>} : memref<1x128xf32, #tpu.memory_space<vmem>>, vector<1x128xf32>,
    return
  }
  func.func @transform_0(%arg0: i32) -> (i32, i32) {
    %c0_i32 = arith.constant 0 : i32
    %c0_i32_0 = arith.constant 0 : i32
    return %c0_i32, %arg0 : i32, i32
  }
  func.func @transform_1(%arg0: i32) -> (i32, i32) {
    %c0_i32 = arith.constant 0 : i32
    %c0_i32_0 = arith.constant 0 : i32
    %c0_i32_1 = arith.constant 0 : i32
    return %c0_i32, %c0_i32_0 : i32, i32
  }
  func.func @transform_2(%arg0: i32) -> (i32, i32) {
    %c0_i32 = arith.constant 0 : i32
    %c0_i32_0 = arith.constant 0 : i32
    %c0_i32_1 = arith.constant 0 : i32
    return %c0_i32, %c0_i32_0 : i32, i32
  }
  func.func @transform_3(%arg0: i32) -> (i32, i32) {
    %c0_i32 = arith.constant 0 : i32
    %c0_i32_0 = arith.constant 0 : i32
    %c0_i32_1 = arith.constant 0 : i32
    return %c0_i32, %c0_i32_0 : i32, i32
  }
  func.func @transform_4(%arg0: i32) -> (i32, i32) {
    %c0_i32 = arith.constant 0 : i32
    %c0_i32_0 = arith.constant 0 : i32
    %c0_i32_1 = arith.constant 0 : i32
    return %c0_i32, %c0_i32_0 : i32, i32
  }
  func.func @transform_5(%arg0: i32) -> (i32, i32) {
    %c0_i32 = arith.constant 0 : i32
    %c0_i32_0 = arith.constant 0 : i32
    %c0_i32_1 = arith.constant 0 : i32
    return %c0_i32, %c0_i32_0 : i32, i32
  }
  func.func @transform_6(%arg0: i32) -> i32 {
    %c0_i32 = arith.constant 0 : i32
    %c0_i32_0 = arith.constant 0 : i32
    return %c0_i32 : i32
  }
  func.func @transform_7(%arg0: i32) -> (i32, i32) {
    %c0_i32 = arith.constant 0 : i32
    %c0_i32_0 = arith.constant 0 : i32
    return %c0_i32, %arg0 : i32, i32
  }
}

</mosaic_0001>

<bundles_post_ra>
// kernel: tpu_custom_call.1
= control target key start
LH: loop header
LB: loop body
LE: loop exit
PB: predicated region body
PF: predicated region fallthrough
CT: control target
= control target key end

     0   :  { %vm72_vm0 = vcmask 1044480   ;;  %vm59_vm1 = vcmask 171008   ;;  %v1675_v29 = vmov 0   ;;  %s1976_s0 = inlined_call_operand.vmem [shape: f32[21,128], index: 0, kind: input, shape index: {}]   ;;  %s1977_s1 = inlined_call_operand.vmem [shape: f32[32,21], index: 1, kind: input, shape index: {}]   ;;  %s1978_s2 = inlined_call_operand.vmem [shape: f32[32,1], index: 2, kind: input, shape index: {}]   ;;  %s1979_s3 = inlined_call_operand.vmem [shape: f32[32,32], index: 3, kind: input, shape index: {}]   ;;  %s1980_s4 = inlined_call_operand.vmem [shape: f32[32,1], index: 4, kind: input, shape index: {}]   ;;  %s1981_s5 = inlined_call_operand.vmem [shape: f32[32,1], index: 5, kind: input, shape index: {}]   ;;  %s1982_s6 = inlined_call_operand.<no memory space> [shape: f32[1], index: 6, kind: input, shape index: {}]   ;;  %s1983_s7 = inlined_call_operand.hbm [shape: f32[1,128], index: 7, kind: output, shape index: {}]  }
   0x1   :  { %v30_v0 = vld [vmem:[%s1976_s0 + $0x10] sm:$0x1f]  ;;  %v29_v1 = vld [vmem:[%s1976_s0 + $0x8] sm:$0xff]  ;;  %v28_v2 = vld [vmem:[%s1976_s0] sm:$0xff]  ;;  %1643 = vset.pattern.permute.xlu0 %v1675_v29 }
   0x2   :  { %v74_v3 = vsel %vm72_vm0, %v30_v0, 0  ;;  %v1726_v4 = vand.u32 4294901760, %v29_v1  ;;  %v1728_v5 = vand.u32 4294901760, %v28_v2  ;;  %v31_v6 = vld [vmem:[%s1977_s1] sm:$0xff]  ;;  %v32_v7 = vld [vmem:[%s1977_s1 + $0x8] sm:$0xff]  ;;  %v33_v8 = vld [vmem:[%s1977_s1 + $0x10] sm:$0xff] }
   0x3   :  { %v1739_v9 = vand.u32 4294901760, %v74_v3  ;;  %v61_v10 = vsel %vm59_vm1, %v31_v6, 0  ;;  %v64_v11 = vsel %vm59_vm1, %v32_v7, 0  ;;  %v67_v12 = vsel %vm59_vm1, %v33_v8, 0  ;;  %v34_v13 = vld [vmem:[%s1977_s1 + $0x18] sm:$0xff]  ;;  %v36_v30 = vld [vmem:[%s1978_s2 + $0x8] sm:$0xff] }
   0x4   :  { %v1747_v14 = vand.u32 4294901760, %v61_v10  ;;  %v1749_v15 = vand.u32 4294901760, %v64_v11  ;;  %v219_v16 = vsub.f32 %v29_v1, %v1726_v4  ;;  %v1752_v17 = vand.u32 4294901760, %v67_v12  ;;  %v38_v21 = vld [vmem:[%s1978_s2 + $0x18] sm:$0xff] }
   0x5   :  { %1485 = vmatprep.subr.mxu0 %v1739_v9  ;;  %v212_v18 = vsub.f32 %v74_v3, %v1739_v9  ;;  %v226_v19 = vsub.f32 %v28_v2, %v1728_v5  ;;  %v70_v20 = vsel %vm59_vm1, %v34_v13, 0  ;;  %56 = vperm.xlu0 %1643, %v38_v21  }
   0x6   :  { %1486 = vmatpush3.msra.mxu0 %v1739_v9  ;;  %v1763_v22 = vsub.f32 %v61_v10, %v1747_v14  ;;  %v1766_v23 = vsub.f32 %v64_v11, %v1749_v15  ;;  %v1768_v24 = vand.u32 4294901760, %v219_v16  ;;  %v1771_v25 = vsub.f32 %v67_v12, %v1752_v17  ;;  %1503 = vmatprep.mubr.f32.mxu1 %v1747_v14 }
   0x7   :  { %1487 = vmatprep.subr.mxu0 %v1726_v4  ;;  %v213_v26 = vand.u32 4294901760, %v212_v18  ;;  %v1775_v27 = vand.u32 4294901760, %v226_v19  ;;  %v1777_v28 = vand.u32 4294901760, %v70_v20 }
   0x8   :  { %1488 = vmatpush3.msra.mxu0 %v1726_v4  ;;  %v146_v31 = vand.u32 4294901760, %v1763_v22  ;;  %v156_v32 = vand.u32 4294901760, %v1766_v23  ;;  %v221_v33 = vsub.f32 %v219_v16, %v1768_v24  ;;  %v166_v34 = vand.u32 4294901760, %v1771_v25 }
   0x9   :  { %13 = vsyncpa [#allocation4], 0  ;;  %1489 = vmatprep.subr.mxu0 %v1728_v5  ;;  %v214_v35 = vsub.f32 %v212_v18, %v213_v26  ;;  %v228_v36 = vsub.f32 %v226_v19, %v1775_v27  ;;  %v175_v37 = vsub.f32 %v70_v20, %v1777_v28  ;;  %1644 = vset.pattern.permute.xlu1 %v1675_v29  ;;  %v37_v38 = vld [vmem:[%s1978_s2 + $0x10] sm:$0xff]  ;;  %v685_v51 = vld [vmem:[%s1980_s4] sm:$0xff]  ;;  %vm709_vm2 = vcmask 261120   ;;  %s1676_s18 = smov [#allocation3]  }
   0xa   :  { %1490 = vmatpush3.msra.mxu0 %v1728_v5  ;;  %v147_v39 = vsub.f32 %v1763_v22, %v146_v31  ;;  %v157_v40 = vsub.f32 %v1766_v23, %v156_v32  ;;  %v167_v41 = vsub.f32 %v1771_v25, %v166_v34  ;;  %46 = vperm.xlu1 %1644, %v36_v30   ;;  %v222_v43 = vand.u32 4294901760, %v221_v33  ;;  %v35_v52 = vld [vmem:[%s1978_s2] sm:$0xff]  ;;  %v687_v53 = vld [vmem:[%s1980_s4 + $0x10] sm:$0xff]  ;;  %v686_v54 = vld [vmem:[%s1980_s4 + $0x8] sm:$0xff]  ;;  %s1387_s19 = sshll.u32 %s1676_s18, 4  ;;  %s1388_s19 = int_to_ptr.vmem [resolvable:$true] %s1387_s19 }
   0xb   :  { %v215_v42 = vand.u32 4294901760, %v214_v35  ;;  %1509 = vmatprep.subr.mxu0 %v212_v18  ;;  %v176_v44 = vand.u32 4294901760, %v175_v37  ;;  %51 = vperm.xlu0 %1643, %v37_v38   ;;  %v229_v48 = vand.u32 4294901760, %v228_v36  ;;  %v1340_v55 = vld [vmem:[%s1981_s5] sm:$0xff]  ;;  %v688_v56 = vld [vmem:[%s1980_s4 + $0x18] sm:$0xff]  ;;  %v1342_v57 = vld [vmem:[%s1981_s5 + $0x10] sm:$0xff]  ;;  %p1658_p1 = scmp.lt.s32.totalorder %s1388_s19, %s1388_s19 }
   0xc   :  { %v148_v45 = vand.u32 4294901760, %v147_v39  ;;  %v158_v46 = vand.u32 4294901760, %v157_v40  ;;  %v168_v47 = vand.u32 4294901760, %v167_v41  ;;  %v1341_v58 = vld [vmem:[%s1981_s5 + $0x8] sm:$0xff]  ;;  %v1343_v59 = vld [vmem:[%s1981_s5 + $0x18] sm:$0xff]  ;;  %v681_v60 = vld [vmem:[%s1979_s3] sm:$0xff] }
   0xd   :  { %1497 = vmatprep.subr.mxu1 %v215_v42  ;;  %v177_v49 = vsub.f32 %v175_v37, %v176_v44  ;;  %v711_v61 = vsel %vm709_vm2, %v681_v60, 0  ;;  %s1653_s20 = scalar_lea.vmem %s1388_s19, 16  ;;  %s1657_s21 = scalar_lea.vmem %s1388_s19, 32 }
   0xe   :  { %1491 = vmatprep.mubr.f32.mxu0 %v148_v45  ;;  %1498 = vmatpush3.msra.mxu1 %v215_v42  ;;  %v1862_v62 = vand.u32 4294901760, %v711_v61  ;;  %p1654_p0 = scmp.ne.s32.totalorder %s1388_s19, %s1653_s20  ;;  %p1659_p2 = scmp.lt.s32.totalorder %s1657_s21, %s1653_s20 }
   0xf   :  { %1492 = vmatmul.mubr.f32.vlgmr.msra.gmra.mxu0 %v158_v46  ;;  %1499 = vmatprep.subr.mxu1 %v222_v43  ;;  %v178_v50 = vand.u32 4294901760, %v177_v49 }
  0x10   :  { %1500 = vmatpush3.msra.mxu1 %v222_v43  ;;  %1494 = vmatprep.mubr.f32.mxu0 %v168_v47  ;;  %v1865_v63 = vsub.f32 %v711_v61, %v1862_v62  ;;  %p1660_p3 = por %p1659_p2, %p1658_p1 }
  0x11   :  { %1501 = vmatprep.subr.mxu1 %v229_v48  ;;  %1510 = vmatpush3.msra.mxu0 %v212_v18 }
  0x12   :  { %1502 = vmatpush3.msra.mxu1 %v229_v48  ;;  %1511 = vmatprep.subr.mxu0 %v219_v16  ;;  %v793_v0 = vand.u32 4294901760, %v1865_v63  ;;  %p1661_p4 = pnand %p1660_p3, %p1654_p0 }
  0x13   :  { %1495 = vmatmul.mubr.f32.gmra.mxu0 %v178_v50  ;;  %1504 = vmatmul.mubr.f32.vlgmr.msra.gmra.mxu1 %v1749_v15 }
  0x14   :  { %1512 = vmatpush3.msra.mxu0 %v219_v16  ;;  %1521 = vmatprep.subr.mxu1 %v1739_v9  ;;  %v794_v1 = vsub.f32 %v1865_v63, %v793_v0 }
  0x15   :  { %1513 = vmatprep.subr.mxu0 %v226_v19  ;;  %1522 = vmatpush3.msra.mxu1 %v1739_v9 }
  0x16   :  { %1514 = vmatpush3.msra.mxu0 %v226_v19  ;;  %1515 = vmatprep.mubr.f32.mxu0 %v1763_v22  ;;  %v795_v2 = vand.u32 4294901760, %v794_v1 }
  0x17   :  { %1506 = vmatprep.mubr.f32.mxu1 %v1752_v17  ;;  %1516 = vmatmul.mubr.f32.vlgmr.msra.gmra.mxu0 %v1766_v23 }
  0x18   :  { %1523 = vmatprep.subr.mxu1 %v1726_v4  ;;  %1507 = vmatmul.mubr.f32.gmra.mxu1 %v1777_v28 }
  0x19   :  { %1524 = vmatpush3.msra.mxu1 %v1726_v4  ;;  %1533 = vmatprep.subr.mxu0 %v213_v26 }
  0x1a   :  { %1518 = vmatprep.mubr.f32.mxu0 %v1771_v25  ;;  %1525 = vmatprep.subr.mxu1 %v1728_v5 }
  0x1b   :  { %1534 = vmatpush3.msra.mxu0 %v213_v26  ;;  %1526 = vmatpush3.msra.mxu1 %v1728_v5 }
  0x1c   :  { %1519 = vmatmul.mubr.f32.gmra.mxu0 %v175_v37  ;;  %1527 = vmatprep.mubr.f32.mxu1 %v146_v31 }
  0x1d   :  { %1535 = vmatprep.subr.mxu0 %v1768_v24  ;;  %1528 = vmatmul.mubr.f32.vlgmr.msra.gmra.mxu1 %v156_v32 }
  0x1e   :  { %1536 = vmatpush3.msra.mxu0 %v1768_v24  ;;  %1545 = vmatprep.subr.mxu1 %v1739_v9 }
  0x1f   :  { %1537 = vmatprep.subr.mxu0 %v1775_v27  ;;  %1546 = vmatpush3.msra.mxu1 %v1739_v9 }
  0x20   :  { %1538 = vmatpush3.msra.mxu0 %v1775_v27  ;;  %1539 = vmatprep.mubr.f32.mxu0 %v1747_v14 }
  0x21   :  { %1530 = vmatprep.mubr.f32.mxu1 %v166_v34  ;;  %1540 = vmatmul.mubr.f32.vlgmr.msra.gmra.mxu0 %v1749_v15 }
  0x22   :  { %1547 = vmatprep.subr.mxu1 %v1726_v4  ;;  %1531 = vmatmul.mubr.f32.gmra.mxu1 %v176_v44 }
  0x23   :  { %1548 = vmatpush3.msra.mxu1 %v1726_v4  ;;  %1542 = vmatprep.mubr.f32.mxu0 %v1752_v17 }
  0x24   :  { %1549 = vmatprep.subr.mxu1 %v1728_v5  ;;  %1551 = vmatprep.mubr.f32.mxu1 %v1747_v14 }
  0x25   :  { %1543 = vmatmul.mubr.f32.gmra.mxu0 %v1777_v28  ;;  %1550 = vmatpush3.msra.mxu1 %v1728_v5 }
  0x26   :  { %1552 = vmatmul.mubr.f32.vlgmr.msra.gmra.mxu1 %v1749_v15  ;;  %691 = vperm.xlu0 %1643, %v685_v51  }
  0x27   :  { %1554 = vmatprep.mubr.f32.mxu1 %v1752_v17  ;;  %41 = vperm.xlu1 %1644, %v35_v52  }
  0x28   :  { %1565 = vmatprep.mubr.f32.mxu0 %v795_v2 }
  0x2a   :  { %1555 = vmatmul.mubr.f32.gmra.mxu1 %v1777_v28  ;;  %701 = vperm.xlu0 %1643, %v687_v53   ;;  %v682_v53 = vld [vmem:[%s1979_s3 + $0x8] sm:$0xff] }
  0x2b   :  { %696 = vperm.xlu1 %1644, %v686_v54   ;;  %1579 = vmatprep.mubr.f32.mxu1 %v1862_v62 }
  0x2e   :  { %1346 = vperm.xlu0 %1643, %v1340_v55  }
  0x2f   :  { %706 = vperm.xlu1 %1644, %v688_v56   ;;  %v714_v56 = vsel %vm709_vm2, %v682_v53, 0 }
  0x32   :  { %1356 = vperm.xlu0 %1643, %v1342_v57   ;;  %v683_v57 = vld [vmem:[%s1979_s3 + $0x10] sm:$0xff] }
  0x33   :  { %1351 = vperm.xlu1 %1644, %v1341_v58   ;;  %v684_v58 = vld [vmem:[%s1979_s3 + $0x18] sm:$0xff]  ;;  %v717_v60 = vsel %vm709_vm2, %v683_v57, 0 }
  0x34   :  { %v720_v61 = vsel %vm709_vm2, %v684_v58, 0  ;;  %v1886_v1 = vand.u32 4294901760, %v717_v60 }
  0x37   :  { %1361 = vperm.xlu1 %1644, %v1343_v59   ;;  %v1882_v59 = vand.u32 4294901760, %v714_v56 }
  0x39   :  { %v1889_v2 = vsub.f32 %v714_v56, %v1882_v59 }
  0x80   :  { %v57_v12 = vpop.permute.xlu0 %56 }
  0x85   :  { %v47_v7 = vpop.permute.xlu1 %46 }
  0x86   :  { %v52_v23 = vpop.permute.xlu0 %51 }
  0xa2   :  { %v42_v15 = vpop.permute.xlu1 %41 }
  0xcf   :  { %v1493_v3 = vpop.f32.mrf.mxu0 }
  0xd0   :  { %v161_v10 = vadd.f32 %v1493_v3, %v47_v7  ;;  %v1896_v7 = vsub.f32 %v717_v60, %v1886_v1 }
  0xd1   :  { %v150_v4 = vpop.f32.mrf.mxu0 }
  0xd2   :  { %v151_v17 = vadd.f32 %v150_v4, %v42_v15  ;;  %v1891_v4 = vand.u32 4294901760, %v720_v61 }
  0xd3   :  { %v1496_v5 = vpop.f32.mrf.mxu0  ;;  %v1505_v6 = vpop.f32.mrf.mxu1 }
  0xd4   :  { %v181_v18 = vadd.f32 %v1496_v5, %v57_v12  ;;  %v273_v19 = vadd.f32 %v1505_v6, %v161_v10 }
  0xd5   :  { %v170_v8 = vpop.f32.mrf.mxu0  ;;  %v266_v9 = vpop.f32.mrf.mxu1 }
  0xd6   :  { %v267_v21 = vadd.f32 %v266_v9, %v151_v17  ;;  %v171_v25 = vadd.f32 %v170_v8, %v52_v23  ;;  %v803_v8 = vand.u32 4294901760, %v1889_v2 }
  0xd7   :  { %v1517_v11 = vpop.f32.mrf.mxu0 }
  0xd8   :  { %v1508_v13 = vpop.f32.mrf.mxu1  ;;  %v370_v26 = vadd.f32 %v1517_v11, %v273_v19  ;;  %v1902_v11 = vsub.f32 %v720_v61, %v1891_v4  ;;  %v804_v17 = vsub.f32 %v1889_v2, %v803_v8 }
  0xd9   :  { %v362_v14 = vpop.f32.mrf.mxu0  ;;  %v285_v27 = vadd.f32 %v1508_v13, %v181_v18 }
  0xda   :  { %v278_v16 = vpop.f32.mrf.mxu1  ;;  %v363_v29 = vadd.f32 %v362_v14, %v267_v21  ;;  %v813_v14 = vand.u32 4294901760, %v1896_v7  ;;  %v823_v19 = vand.u32 4294901760, %v1902_v11 }
  0xdb   :  { %v279_v30 = vadd.f32 %v278_v16, %v171_v25  ;;  %v805_v25 = vand.u32 4294901760, %v804_v17 }
  0xdc   :  { %v1520_v20 = vpop.f32.mrf.mxu0  ;;  %v814_v23 = vsub.f32 %v1896_v7, %v813_v14 }
  0xdd   :  { %v1529_v22 = vpop.f32.mrf.mxu1  ;;  %v384_v34 = vadd.f32 %v1520_v20, %v285_v27 }
  0xde   :  { %v376_v24 = vpop.f32.mrf.mxu0  ;;  %v468_v31 = vadd.f32 %v1529_v22, %v370_v26 }
  0xdf   :  { %v459_v28 = vpop.f32.mrf.mxu1  ;;  %v377_v38 = vadd.f32 %v376_v24, %v279_v30 }
  0xe0   :  { %v460_v35 = vadd.f32 %v459_v28, %v363_v29  ;;  %v824_v28 = vsub.f32 %v1902_v11, %v823_v19 }
  0xe1   :  { %v1541_v32 = vpop.f32.mrf.mxu0 }
  0xe2   :  { %v1532_v33 = vpop.f32.mrf.mxu1  ;;  %v570_v39 = vadd.f32 %v1541_v32, %v468_v31  ;;  %v815_v32 = vand.u32 4294901760, %v814_v23 }
  0xe3   :  { %v563_v36 = vpop.f32.mrf.mxu0  ;;  %v484_v40 = vadd.f32 %v1532_v33, %v384_v34 }
  0xe4   :  { %v475_v37 = vpop.f32.mrf.mxu1  ;;  %v564_v43 = vadd.f32 %v563_v36, %v460_v35  ;;  %v825_v35 = vand.u32 4294901760, %v824_v28 }
  0xe5   :  { %v1544_v41 = vpop.f32.mrf.mxu0  ;;  %v476_v44 = vadd.f32 %v475_v37, %v377_v38 }
  0xe6   :  { %v1553_v42 = vpop.f32.mrf.mxu1  ;;  %v582_v48 = vadd.f32 %v1544_v41, %v484_v40 }
  0xe7   :  { %v662_v45 = vadd.f32 %v1553_v42, %v570_v39  ;;  %v575_v46 = vpop.f32.mrf.mxu0 }
  0xe8   :  { %v655_v47 = vpop.f32.mrf.mxu1  ;;  %v576_v51 = vadd.f32 %v575_v46, %v476_v44  ;;  %v697_v44 = vpop.permute.xlu1 %696 }
  0xe9   :  { %1645 = vtanh.f32 %v662_v45  ;;  %v656_v49 = vadd.f32 %v655_v47, %v564_v43  ;;  %v692_v47 = vpop.permute.xlu0 %691 }
  0xea   :  { %v1556_v50 = vpop.f32.mrf.mxu1 }
  0xeb   :  { %1647 = vtanh.f32 %v656_v49  ;;  %v674_v52 = vadd.f32 %v1556_v50, %v582_v48 }
  0xec   :  { %v667_v54 = vpop.f32.mrf.mxu1 }
  0xed   :  { %1649 = vtanh.f32 %v674_v52  ;;  %v668_v55 = vadd.f32 %v667_v54, %v576_v51  ;;  %v707_v52 = vpop.permute.xlu1 %706  ;;  %v702_v57 = vpop.permute.xlu0 %701 }
  0xef   :  { %1651 = vtanh.f32 %v668_v55 }
  0xf1   :  { %v1352_v28 = vpop.permute.xlu1 %1351 }
  0xf6   :  { %v1646_v3 = vpop.eup %1645 }
  0xf7   :  { %v1893_v6 = vand.u32 4294901760, %v1646_v3 }
  0xf8   :  { %v1648_v5 = vpop.eup %1647 }
  0xf9   :  { %v1899_v10 = vand.u32 4294901760, %v1648_v5  ;;  %v871_v15 = vsub.f32 %v1646_v3, %v1893_v6 }
  0xfa   :  { %v1650_v9 = vpop.eup %1649 }
  0xfb   :  { %v1904_v12 = vand.u32 4294901760, %v1650_v9  ;;  %v878_v20 = vsub.f32 %v1648_v5, %v1899_v10  ;;  %v872_v24 = vand.u32 4294901760, %v871_v15 }
  0xfc   :  { %v1652_v13 = vpop.eup %1651 }
  0xfd   :  { %v1908_v16 = vand.u32 4294901760, %v1652_v13  ;;  %1557 = vmatprep.subr.mxu0 %v1904_v12  ;;  %v857_v18 = vsub.f32 %v1650_v9, %v1904_v12  ;;  %v879_v29 = vand.u32 4294901760, %v878_v20  ;;  %v873_v33 = vsub.f32 %v871_v15, %v872_v24 }
  0xfe   :  { %1558 = vmatpush3.msra.mxu0 %v1904_v12 }
  0xff   :  { %1559 = vmatprep.subr.mxu0 %v1908_v16  ;;  %v858_v21 = vand.u32 4294901760, %v857_v18  ;;  %v864_v22 = vsub.f32 %v1652_v13, %v1908_v16  ;;  %v880_v36 = vsub.f32 %v878_v20, %v879_v29  ;;  %v874_v37 = vand.u32 4294901760, %v873_v33 }
 0x100   :  { %1560 = vmatpush3.msra.mxu0 %v1908_v16 }
 0x101   :  { %1561 = vmatprep.subr.mxu0 %v1893_v6  ;;  %v859_v26 = vsub.f32 %v857_v18, %v858_v21  ;;  %v865_v27 = vand.u32 4294901760, %v864_v22  ;;  %v881_v38 = vand.u32 4294901760, %v880_v36 }
 0x102   :  { %1562 = vmatpush3.msra.mxu0 %v1893_v6 }
 0x103   :  { %1563 = vmatprep.subr.mxu0 %v1899_v10  ;;  %v860_v30 = vand.u32 4294901760, %v859_v26  ;;  %v866_v31 = vsub.f32 %v864_v22, %v865_v27 }
 0x104   :  { %1564 = vmatpush3.msra.mxu0 %v1899_v10 }
 0x105   :  { %1566 = vmatmul.mubr.f32.vlgmr.msra.gmra.mxu0 %v805_v25  ;;  %1571 = vmatprep.subr.mxu1 %v860_v30  ;;  %v867_v34 = vand.u32 4294901760, %v866_v31 }
 0x106   :  { %1585 = vmatprep.subr.mxu0 %v857_v18  ;;  %1572 = vmatpush3.msra.mxu1 %v860_v30 }
 0x107   :  { %1586 = vmatpush3.msra.mxu0 %v857_v18  ;;  %1573 = vmatprep.subr.mxu1 %v867_v34 }
 0x108   :  { %1587 = vmatprep.subr.mxu0 %v864_v22  ;;  %1568 = vmatprep.mubr.f32.mxu0 %v815_v32 }
 0x109   :  { %1574 = vmatpush3.msra.mxu1 %v867_v34  ;;  %1588 = vmatpush3.msra.mxu0 %v864_v22  ;;  %v1347_v22 = vpop.permute.xlu0 %1346 }
 0x10a   :  { %1569 = vmatmul.mubr.f32.gmra.mxu0 %v825_v35  ;;  %1575 = vmatprep.subr.mxu1 %v874_v37 }
 0x10b   :  { %1589 = vmatprep.subr.mxu0 %v871_v15  ;;  %1576 = vmatpush3.msra.mxu1 %v874_v37 }
 0x10c   :  { %1590 = vmatpush3.msra.mxu0 %v871_v15  ;;  %1577 = vmatprep.subr.mxu1 %v881_v38 }
 0x10d   :  { %1591 = vmatprep.subr.mxu0 %v878_v20  ;;  %1578 = vmatpush3.msra.mxu1 %v881_v38  ;;  %v1357_v35 = vpop.permute.xlu0 %1356  ;;  %v1362_v38 = vpop.permute.xlu1 %1361 }
 0x10e   :  { %1592 = vmatpush3.msra.mxu0 %v878_v20  ;;  %1580 = vmatmul.mubr.f32.vlgmr.msra.gmra.mxu1 %v1882_v59 }
 0x10f   :  { %1593 = vmatprep.mubr.f32.mxu0 %v1865_v63  ;;  %1599 = vmatprep.subr.mxu1 %v1904_v12 }
 0x110   :  { %1613 = vmatprep.subr.mxu0 %v858_v21  ;;  %1594 = vmatmul.mubr.f32.vlgmr.msra.gmra.mxu0 %v1889_v2 }
 0x111   :  { %1600 = vmatpush3.msra.mxu1 %v1904_v12  ;;  %1614 = vmatpush3.msra.mxu0 %v858_v21 }
 0x112   :  { %1601 = vmatprep.subr.mxu1 %v1908_v16  ;;  %1615 = vmatprep.subr.mxu0 %v865_v27 }
 0x113   :  { %1582 = vmatprep.mubr.f32.mxu1 %v1886_v1  ;;  %1602 = vmatpush3.msra.mxu1 %v1908_v16 }
 0x114   :  { %1616 = vmatpush3.msra.mxu0 %v865_v27  ;;  %1583 = vmatmul.mubr.f32.gmra.mxu1 %v1891_v4 }
 0x115   :  { %1603 = vmatprep.subr.mxu1 %v1893_v6  ;;  %1617 = vmatprep.subr.mxu0 %v872_v24 }
 0x116   :  { %1596 = vmatprep.mubr.f32.mxu0 %v1896_v7  ;;  %1604 = vmatpush3.msra.mxu1 %v1893_v6 }
 0x117   :  { %1618 = vmatpush3.msra.mxu0 %v872_v24  ;;  %1605 = vmatprep.subr.mxu1 %v1899_v10 }
 0x118   :  { %1597 = vmatmul.mubr.f32.gmra.mxu0 %v1902_v11  ;;  %1619 = vmatprep.subr.mxu0 %v879_v29 }
 0x119   :  { %1606 = vmatpush3.msra.mxu1 %v1899_v10  ;;  %1607 = vmatprep.mubr.f32.mxu1 %v793_v0 }
 0x11a   :  { %1620 = vmatpush3.msra.mxu0 %v879_v29  ;;  %1608 = vmatmul.mubr.f32.vlgmr.msra.gmra.mxu1 %v803_v8 }
 0x11b   :  { %1627 = vmatprep.subr.mxu1 %v1904_v12  ;;  %1621 = vmatprep.mubr.f32.mxu0 %v1862_v62 }
 0x11c   :  { %1628 = vmatpush3.msra.mxu1 %v1904_v12  ;;  %1622 = vmatmul.mubr.f32.vlgmr.msra.gmra.mxu0 %v1882_v59 }
 0x11d   :  { %1629 = vmatprep.subr.mxu1 %v1908_v16  ;;  %1610 = vmatprep.mubr.f32.mxu1 %v813_v14 }
 0x11e   :  { %1630 = vmatpush3.msra.mxu1 %v1908_v16  ;;  %1624 = vmatprep.mubr.f32.mxu0 %v1886_v1 }
 0x11f   :  { %1611 = vmatmul.mubr.f32.gmra.mxu1 %v823_v19  ;;  %1631 = vmatprep.subr.mxu1 %v1893_v6 }
 0x120   :  { %1632 = vmatpush3.msra.mxu1 %v1893_v6  ;;  %1625 = vmatmul.mubr.f32.gmra.mxu0 %v1891_v4 }
 0x121   :  { %1633 = vmatprep.subr.mxu1 %v1899_v10  ;;  %1635 = vmatprep.mubr.f32.mxu1 %v1862_v62 }
 0x122   :  { %1634 = vmatpush3.msra.mxu1 %v1899_v10 }
 0x123   :  { %1636 = vmatmul.mubr.f32.vlgmr.msra.gmra.mxu1 %v1882_v59 }
 0x124   :  { %1638 = vmatprep.mubr.f32.mxu1 %v1886_v1 }
 0x127   :  { %1639 = vmatmul.mubr.f32.gmra.mxu1 %v1891_v4 }
 0x1c5   :  { %v1567_v63 = vpop.f32.mrf.mxu0 }
 0x1c6   :  { %v808_v62 = vadd.f32 %v1567_v63, %v697_v44 }
 0x1c7   :  { %v797_v0 = vpop.f32.mrf.mxu0 }
 0x1c8   :  { %v798_v49 = vadd.f32 %v797_v0, %v692_v47 }
 0x1ca   :  { %v1570_v39 = vpop.f32.mrf.mxu0 }
 0x1cb   :  { %v828_v53 = vadd.f32 %v1570_v39, %v707_v52 }
 0x1cc   :  { %v817_v40 = vpop.f32.mrf.mxu0 }
 0x1cd   :  { %v818_v58 = vadd.f32 %v817_v40, %v702_v57 }
 0x1ce   :  { %v1581_v41 = vpop.f32.mrf.mxu1 }
 0x1cf   :  { %v925_v50 = vadd.f32 %v1581_v41, %v808_v62 }
 0x1d0   :  { %v918_v42 = vpop.f32.mrf.mxu1  ;;  %v1595_v43 = vpop.f32.mrf.mxu0 }
 0x1d1   :  { %v919_v54 = vadd.f32 %v918_v42, %v798_v49  ;;  %v1024_v59 = vadd.f32 %v1595_v43, %v925_v50 }
 0x1d2   :  { %v1016_v46 = vpop.f32.mrf.mxu0 }
 0x1d3   :  { %v1017_v2 = vadd.f32 %v1016_v46, %v919_v54 }
 0x1d4   :  { %v1584_v45 = vpop.f32.mrf.mxu1 }
 0x1d5   :  { %v937_v60 = vadd.f32 %v1584_v45, %v828_v53  ;;  %v1378_v45 = vstv %s1982_s6 }
 0x1d6   :  { %v930_v48 = vpop.f32.mrf.mxu1 }
 0x1d7   :  { %v931_v3 = vadd.f32 %v930_v48, %v818_v58 }
 0x1d8   :  { %v1598_v51 = vpop.f32.mrf.mxu0 }
 0x1d9   :  { %v1038_v7 = vadd.f32 %v1598_v51, %v937_v60 }
 0x1da   :  { %v1030_v55 = vpop.f32.mrf.mxu0  ;;  %v1609_v56 = vpop.f32.mrf.mxu1 }
 0x1db   :  { %v1123_v4 = vadd.f32 %v1609_v56, %v1024_v59  ;;  %v1031_v11 = vadd.f32 %v1030_v55, %v931_v3 }
 0x1dc   :  { %v1114_v61 = vpop.f32.mrf.mxu1  ;;  %v1623_v1 = vpop.f32.mrf.mxu0 }
 0x1dd   :  { %v1115_v8 = vadd.f32 %v1114_v61, %v1017_v2  ;;  %v1228_v12 = vadd.f32 %v1623_v1, %v1123_v4 }
 0x1de   :  { %v1221_v5 = vpop.f32.mrf.mxu0 }
 0x1df   :  { %v1612_v6 = vpop.f32.mrf.mxu1  ;;  %v1222_v15 = vadd.f32 %v1221_v5, %v1115_v8 }
 0x1e0   :  { %v1626_v10 = vpop.f32.mrf.mxu0  ;;  %v1139_v13 = vadd.f32 %v1612_v6, %v1038_v7 }
 0x1e1   :  { %v1130_v9 = vpop.f32.mrf.mxu1 }
 0x1e2   :  { %v1131_v16 = vadd.f32 %v1130_v9, %v1031_v11  ;;  %v1233_v18 = vpop.f32.mrf.mxu0  ;;  %v1240_v20 = vadd.f32 %v1626_v10, %v1139_v13 }
 0x1e3   :  { %v1637_v14 = vpop.f32.mrf.mxu1 }
 0x1e4   :  { %v1321_v17 = vadd.f32 %v1637_v14, %v1228_v12  ;;  %v1234_v24 = vadd.f32 %v1233_v18, %v1131_v16 }
 0x1e5   :  { %v1314_v19 = vpop.f32.mrf.mxu1 }
 0x1e6   :  { %v1315_v21 = vadd.f32 %v1314_v19, %v1222_v15  ;;  %v1337_v25 = vmax.f32 %v1321_v17, 0.0 }
 0x1e7   :  { %v1640_v23 = vpop.f32.mrf.mxu1 }
 0x1e8   :  { %v1336_v26 = vmax.f32 %v1315_v21, 0.0  ;;  %v1333_v27 = vadd.f32 %v1640_v23, %v1240_v20  ;;  %v1365_v32 = vmul.f32 %v1352_v28, %v1337_v25 }
 0x1e9   :  { %v1326_v29 = vpop.f32.mrf.mxu1 }
 0x1ea   :  { %v1364_v30 = vmul.f32 %v1347_v22, %v1336_v26  ;;  %v1327_v31 = vadd.f32 %v1326_v29, %v1234_v24  ;;  %v1339_v33 = vmax.f32 %v1333_v27, 0.0 }
 0x1ec   :  { %v1338_v34 = vmax.f32 %v1327_v31, 0.0  ;;  %v1368_v36 = vadd.f32 %v1365_v32, %v1364_v30  ;;  %v1367_v63 = vmul.f32 %v1362_v38, %v1339_v33 }
 0x1ee   :  { %v1366_v37 = vmul.f32 %v1357_v35, %v1338_v34 }
 0x1f0   :  { %v1369_v0 = vadd.f32 %v1368_v36, %v1366_v37 }
 0x1f2   :  { %v1370_v39 = vadd.f32 %v1369_v0, %v1367_v63 }
 0x1f4   :  { %v1371_v40 = vrot.slane %v1370_v39, 4 }
 0x1f6   :  { %v1372_v41 = vadd.f32 %v1371_v40, %v1370_v39 }
 0x1f8   :  { %v1373_v42 = vrot.slane %v1372_v41, 2 }
 0x1fa   :  { %v1374_v43 = vadd.f32 %v1373_v42, %v1372_v41 }
 0x1fc   :  { %v1375_v44 = vrot.slane %v1374_v43, 1 }
 0x1fe   :  { %v1376_v46 = vadd.f32 %v1375_v44, %v1374_v43 }
 0x200   :  { %v1379_v47 = vadd.f32 %v1378_v45, %v1376_v46 }
 0x202   :  { %1380 = vst [vmem:[#allocation3] sm:$0x1] %v1379_v47 }
 0x203   :  { %1664 = shalt.err (!%p1661_p4)
}
 0x204   :  { %1390 = dma.vmem_to_hbm [thread:$0]  %s1388_s19, 16, %s1983_s7, [#allocation4]  }
 0x205   :  { %1673 = dma.done.wait [#allocation4], 16  }
 0x206   :  { %1674 = vsyncadd [#allocation4], 4294967280 }
 0x207   :  { %1394 = vsyncpa [#allocation4], 1 }

</bundles_post_ra>
